<compile_context>
chip_gen: v5e
topology: v5e:2x2
jax: 0.10.0
libtpu: 0.0.40
codegen_flags: <defaults>
</compile_context>

<pallas_src>
import functools

import jax
import jax.numpy as jnp
from jax.experimental import pallas as pl
from jax.experimental.pallas import tpu as pltpu


_LANE = 128
_NEG_BIG = -1e30  # pad value for fake logit columns; exp() underflows to 0.0


def _round_up(n, m):
    return ((n + m - 1) // m) * m


def classifier_kernel(x_ref, w1_ref, b1_ref, w2_ref, b2_ref, o_ref):
    # fc1: bf16 MXU matmul, f32 accumulate; bias + ReLU on the VPU in f32.
    h = jnp.dot(x_ref[...], w1_ref[...], preferred_element_type=jnp.float32)
    h = jnp.maximum(h + b1_ref[...], 0.0)

    # Dropout(p=0.2) is an identity in eval mode (matches PyTorch .eval()).
    # TODO(synk): training-mode dropout would use pltpu.prng_seed +
    # pltpu.prng_random_bits to build a Bernoulli keep-mask scaled by 1/(1-p).

    # fc2: bf16 MXU matmul, f32 accumulate.  Output columns are padded to a
    # full 128-lane width; padded columns carry bias -1e30 so they vanish in
    # the softmax normalizer and the final store is unmasked / lane-dense.
    logits = jnp.dot(h.astype(jnp.bfloat16), w2_ref[...],
                     preferred_element_type=jnp.float32)
    logits = logits + b2_ref[...]

    # log_softmax over dim=1 (numerically stable), all in f32.
    m = jnp.max(logits, axis=1, keepdims=True)
    s = logits - m
    lse = jnp.log(jnp.sum(jnp.exp(s), axis=1, keepdims=True))
    o_ref[...] = (s - lse).astype(o_ref.dtype)


def prepare_params(w1, b1, w2, b2):
    """One-time parameter prep (hoisted out of the per-call wrapper):
    pre-transpose weights to (in, out) layout, cast matmul operands to bf16,
    and lane-pad the class dimension of fc2 to 128."""
    w1_t = jnp.asarray(w1).T.astype(jnp.bfloat16)               # (784, 256)
    b1_2d = jnp.asarray(b1).reshape(1, -1).astype(jnp.float32)  # (1, 256)
    w2_t = jnp.asarray(w2).T.astype(jnp.float32)                # (256, 10)
    b2_2d = jnp.asarray(b2).reshape(1, -1).astype(jnp.float32)  # (1, 10)

    C = w2_t.shape[1]
    Cp = _round_up(C, _LANE)
    w2_p = jnp.pad(w2_t, ((0, 0), (0, Cp - C))).astype(jnp.bfloat16)  # (256,128)
    b2_p = jnp.pad(b2_2d, ((0, 0), (0, Cp - C)),
                   constant_values=_NEG_BIG)                          # (1,128)
    return w1_t, b1_2d, w2_p, b2_p, C


@functools.partial(jax.jit, static_argnames=("num_classes", "tb"))
def classifier_forward(x_nchw, w1_t, b1_2d, w2_p, b2_p, num_classes=10,
                       tb=1024):
    """x_nchw: (B, 1, 28, 28). Returns (B, num_classes) f32 log-probabilities."""
    B = x_nchw.shape[0]
    D_in = w1_t.shape[0]   # 784
    H = w1_t.shape[1]      # 256
    Cp = w2_p.shape[1]     # 128 (lane-padded classes)

    x = x_nchw.reshape(B, -1).astype(jnp.bfloat16)   # (B, 784), same as .view

    # Batch tile: multiple of 16 (bf16 sublane packing); whole padded batch if
    # it is smaller than the target tile.
    TB = min(tb, _round_up(B, 16))
    Bp = _round_up(B, TB)
    if Bp != B:
        x = jnp.pad(x, ((0, Bp - B), (0, 0)))

    out = pl.pallas_call(
        classifier_kernel,
        out_shape=jax.ShapeDtypeStruct((Bp, Cp), jnp.float32),
        grid_spec=pltpu.PrefetchScalarGridSpec(
            num_scalar_prefetch=0,
            grid=(Bp // TB,),
            in_specs=[
                pl.BlockSpec((TB, D_in), lambda i: (i, 0)),   # x tile per step
                pl.BlockSpec((D_in, H), lambda i: (0, 0)),    # W1 resident
                pl.BlockSpec((1, H), lambda i: (0, 0)),       # b1 resident
                pl.BlockSpec((H, Cp), lambda i: (0, 0)),      # W2 resident
                pl.BlockSpec((1, Cp), lambda i: (0, 0)),      # b2 resident
            ],
            out_specs=pl.BlockSpec((TB, Cp), lambda i: (i, 0)),
        ),
        compiler_params=pltpu.CompilerParams(
            dimension_semantics=("parallel",),   # megacore-shard batch on v7x
        ),
    )(x, w1_t, b1_2d, w2_p, b2_p)
    return out[:B, :num_classes]


def init_params(key):
    """Deterministic init matching nn.Linear default (uniform +/- 1/sqrt(fan_in))."""
    k1, k2, k3, k4 = jax.random.split(key, 4)
    lim1 = 1.0 / jnp.sqrt(784.0)
    lim2 = 1.0 / jnp.sqrt(256.0)
    w1 = jax.random.uniform(k1, (256, 784), jnp.float32, -lim1, lim1)
    b1 = jax.random.uniform(k2, (256,), jnp.float32, -lim1, lim1)
    w2 = jax.random.uniform(k3, (10, 256), jnp.float32, -lim2, lim2)
    b2 = jax.random.uniform(k4, (10,), jnp.float32, -lim2, lim2)
    return w1, b1, w2, b2


if __name__ == "__main__":
    key = jax.random.PRNGKey(0)
    k_params, k_x = jax.random.split(key)
    w1, b1, w2, b2 = init_params(k_params)
    w1_t, b1_2d, w2_p, b2_p, C = prepare_params(w1, b1, w2, b2)  # once, not per call

    B = 8
    x = jax.random.normal(k_x, (B, 1, 28, 28), jnp.float32)  # NCHW like PyTorch

    out = classifier_forward(x, w1_t, b1_2d, w2_p, b2_p, num_classes=C)
    out = jax.block_until_ready(out)

    # Reference with matching bf16-matmul / f32-accumulate numerics.
    x_flat = x.reshape(B, -1).astype(jnp.bfloat16)
    h_ref = jnp.maximum(
        jnp.dot(x_flat, w1.T.astype(jnp.bfloat16),
                preferred_element_type=jnp.float32) + b1, 0.0)
    logits_ref = jnp.dot(h_ref.astype(jnp.bfloat16), w2.T.astype(jnp.bfloat16),
                         preferred_element_type=jnp.float32) + b2
    ref = jax.nn.log_softmax(logits_ref, axis=1)

    assert out.shape == (B, C)
    assert bool(jnp.all(jnp.isfinite(out)))
    assert jnp.allclose(out, ref, atol=2e-2, rtol=2e-2), (
        float(jnp.max(jnp.abs(out - ref))))

    print("KERNEL_OK")
</pallas_src>

<mosaic_0001>
module attributes {stable_mosaic.version = 11 : i64} {
  func.func @classifier_kernel(%arg0: i32, %arg1: memref<16x784xbf16, #tpu.memory_space<vmem>>, %arg2: memref<784x256xbf16, #tpu.memory_space<vmem>>, %arg3: memref<1x256xf32, #tpu.memory_space<vmem>>, %arg4: memref<256x128xbf16, #tpu.memory_space<vmem>>, %arg5: memref<1x128xf32, #tpu.memory_space<vmem>>, %arg6: memref<16x128xf32, #tpu.memory_space<vmem>>) attributes {dimension_semantics = [#tpu.dimension_semantics<parallel>], iteration_bounds = array<i64: 1>, scalar_prefetch = 0 : i64, scratch_operands = 0 : i64, tpu.core_type = #tpu.core_type<tc>, window_params = [{transform_indices = @transform_0, window_bounds = array<i64: 16, 784>}, {pipeline_mode = #tpu.pipeline_mode<synchronous>, transform_indices = @transform_1, window_bounds = array<i64: 784, 256>}, {pipeline_mode = #tpu.pipeline_mode<synchronous>, transform_indices = @transform_2, window_bounds = array<i64: 1, 256>}, {pipeline_mode = #tpu.pipeline_mode<synchronous>, transform_indices = @transform_3, window_bounds = array<i64: 256, 128>}, {pipeline_mode = #tpu.pipeline_mode<synchronous>, transform_indices = @transform_4, window_bounds = array<i64: 1, 128>}, {transform_indices = @transform_5, window_bounds = array<i64: 16, 128>}]} {
    %c0 = arith.constant 0 : index
    %c0_0 = arith.constant 0 : index
    %0 = vector.load %arg1[%c0, %c0_0] : memref<16x784xbf16, #tpu.memory_space<vmem>>, vector<16x784xbf16>
    %c0_1 = arith.constant 0 : index
    %c0_2 = arith.constant 0 : index
    %1 = vector.load %arg2[%c0_1, %c0_2] : memref<784x256xbf16, #tpu.memory_space<vmem>>, vector<784x256xbf16>
    %cst = arith.constant dense<0.000000e+00> : vector<16x256xf32>
    %2 = tpu.matmul %0, %1, %cst {dimension_numbers = #tpu.dot_dimension_numbers<[1], [0], [0], [1], [0, 0, 1, 1], [], []>} : vector<16x784xbf16>, vector<784x256xbf16>, vector<16x256xf32> -> vector<16x256xf32>
    %c0_3 = arith.constant 0 : index
    %c0_4 = arith.constant 0 : index
    %3 = vector.load %arg3[%c0_3, %c0_4] : memref<1x256xf32, #tpu.memory_space<vmem>>, vector<1x256xf32>
    %4 = vector.broadcast %3 : vector<1x256xf32> to vector<16x256xf32>
    %5 = arith.addf %2, %4 : vector<16x256xf32>
    %cst_5 = arith.constant 0.000000e+00 : f32
    %6 = vector.broadcast %cst_5 : f32 to vector<16x256xf32>
    %7 = arith.maximumf %5, %6 : vector<16x256xf32>
    %8 = arith.truncf %7 : vector<16x256xf32> to vector<16x256xbf16>
    %c0_6 = arith.constant 0 : index
    %c0_7 = arith.constant 0 : index
    %9 = vector.load %arg4[%c0_6, %c0_7] : memref<256x128xbf16, #tpu.memory_space<vmem>>, vector<256x128xbf16>
    %cst_8 = arith.constant dense<0.000000e+00> : vector<16x128xf32>
    %10 = tpu.matmul %8, %9, %cst_8 {dimension_numbers = #tpu.dot_dimension_numbers<[1], [0], [0], [1], [0, 0, 1, 1], [], []>} : vector<16x256xbf16>, vector<256x128xbf16>, vector<16x128xf32> -> vector<16x128xf32>
    %c0_9 = arith.constant 0 : index
    %c0_10 = arith.constant 0 : index
    %11 = vector.load %arg5[%c0_9, %c0_10] : memref<1x128xf32, #tpu.memory_space<vmem>>, vector<1x128xf32>
    %12 = vector.broadcast %11 : vector<1x128xf32> to vector<16x128xf32>
    %13 = arith.addf %10, %12 : vector<16x128xf32>
    %cst_11 = arith.constant dense<0xFF800000> : vector<16xf32>
    %14 = vector.multi_reduction <maximumf>, %13, %cst_11 [1] : vector<16x128xf32> to vector<16xf32>
    %15 = vector.shape_cast %14 : vector<16xf32> to vector<16x1xf32>
    %16 = vector.broadcast %15 : vector<16x1xf32> to vector<16x128xf32>
    %17 = arith.subf %13, %16 : vector<16x128xf32>
    %18 = math.exp %17 : vector<16x128xf32>
    %cst_12 = arith.constant dense<0.000000e+00> : vector<16xf32>
    %19 = vector.multi_reduction <add>, %18, %cst_12 [1] : vector<16x128xf32> to vector<16xf32>
    %20 = vector.shape_cast %19 : vector<16xf32> to vector<16x1xf32>
    %21 = math.log %20 : vector<16x1xf32>
    %22 = vector.broadcast %21 : vector<16x1xf32> to vector<16x128xf32>
    %23 = arith.subf %17, %22 : vector<16x128xf32>
    %c0_13 = arith.constant 0 : index
    %c0_14 = arith.constant 0 : index
    %24 = vector.load %arg6[%c0_13, %c0_14] : memref<16x128xf32, #tpu.memory_space<vmem>>, vector<16x128xf32>
    tpu.vector_store %arg6[%c0_13, %c0_14], %23 {strides = array<i32>} : memref<16x128xf32, #tpu.memory_space<vmem>>, vector<16x128xf32>,
    return
  }
  func.func @transform_0(%arg0: i32) -> (i32, i32) {
    %c0_i32 = arith.constant 0 : i32
    %c0_i32_0 = arith.constant 0 : i32
    return %arg0, %c0_i32 : i32, i32
  }
  func.func @transform_1(%arg0: i32) -> (i32, i32) {
    %c0_i32 = arith.constant 0 : i32
    %c0_i32_0 = arith.constant 0 : i32
    %c0_i32_1 = arith.constant 0 : i32
    return %c0_i32, %c0_i32_0 : i32, i32
  }
  func.func @transform_2(%arg0: i32) -> (i32, i32) {
    %c0_i32 = arith.constant 0 : i32
    %c0_i32_0 = arith.constant 0 : i32
    %c0_i32_1 = arith.constant 0 : i32
    return %c0_i32, %c0_i32_0 : i32, i32
  }
  func.func @transform_3(%arg0: i32) -> (i32, i32) {
    %c0_i32 = arith.constant 0 : i32
    %c0_i32_0 = arith.constant 0 : i32
    %c0_i32_1 = arith.constant 0 : i32
    return %c0_i32, %c0_i32_0 : i32, i32
  }
  func.func @transform_4(%arg0: i32) -> (i32, i32) {
    %c0_i32 = arith.constant 0 : i32
    %c0_i32_0 = arith.constant 0 : i32
    %c0_i32_1 = arith.constant 0 : i32
    return %c0_i32, %c0_i32_0 : i32, i32
  }
  func.func @transform_5(%arg0: i32) -> (i32, i32) {
    %c0_i32 = arith.constant 0 : i32
    %c0_i32_0 = arith.constant 0 : i32
    return %arg0, %c0_i32 : i32, i32
  }
}

</mosaic_0001>

<bundles_post_ra>
// kernel: classifier_forward.1
= control target key start
LH: loop header
LB: loop body
LE: loop exit
PB: predicated region body
PF: predicated region fallthrough
CT: control target
= control target key end

     0   :  { %10 = vsyncpa [#allocation3], 0  ;;  %s1712_s21 = smov [#allocation2]   ;;  %s1713_s23 = smov 128   ;;  %s1880_s0 = inlined_call_operand.vmem [shape: bf16[16,784], index: 0, kind: input, shape index: {}]   ;;  %s1881_s1 = inlined_call_operand.hbm [shape: bf16[784,256], index: 1, kind: input, shape index: {}]   ;;  %s1882_s2 = inlined_call_operand.vmem [shape: f32[1,256], index: 2, kind: input, shape index: {}]   ;;  %s1883_s3 = inlined_call_operand.vmem [shape: bf16[256,128], index: 3, kind: input, shape index: {}]   ;;  %s1884_s4 = inlined_call_operand.vmem [shape: f32[1,128], index: 4, kind: input, shape index: {}]   ;;  %s1885_s5 = inlined_call_operand.vmem [shape: f32[16,128], index: 5, kind: output, shape index: {}]  }
   0x1   :  { %s17_s20 = sshll.u32 %s1881_s1, 4  ;;  %s19_s22 = sshll.u32 %s1712_s21, 4  ;;  %s18_s20 = int_to_ptr.hbm [resolvable:$true] %s17_s20  ;;  %s20_s22 = int_to_ptr.vmem [resolvable:$true] %s19_s22 }
   0x2   :  { %s1714_s24 = smov 8  }
   0x3   :  { %25 = dma.hbm_to_vmem [thread:$0]  %s18_s20, 12544, %s20_s22, [#allocation3], %s1713_s23, %s1713_s23, %s1714_s24  }
   0x4   :  { %1710 = dma.done.wait [#allocation3], 12544  }
   0x5   :  { %1711 = vsyncadd [#allocation3], 4294954752  ;;  %v1153_v0 = vld [vmem:[#allocation2 + $0x70] sm:$0xf]  ;;  %v1575_v1 = vld [vmem:[#allocation2 + $0x74] sm:$0xf0] }
   0x6   :  { %v1281_v2 = vld [vmem:[#allocation2 + $0x170] sm:$0xf]  ;;  %v1154_v3 = vor.u32 %v1575_v1, %v1153_v0  ;;  %v1607_v4 = vld [vmem:[#allocation2 + $0x174] sm:$0xf0]  ;;  %v1145_v11 = vld [vmem:[#allocation2 + $0x60] sm:$0xf] }
   0x7   :  { %v1345_v5 = vld [vmem:[#allocation2 + $0x1f0] sm:$0xf]  ;;  %v1623_v6 = vld [vmem:[#allocation2 + $0x1f4] sm:$0xf0]  ;;  %v1282_v7 = vor.u32 %v1607_v4, %v1281_v2  ;;  %v1573_v13 = vld [vmem:[#allocation2 + $0x64] sm:$0xf0] }
   0x8   :  { %v1346_v8 = vor.u32 %v1623_v6, %v1345_v5  ;;  %v1217_v9 = vld [vmem:[#allocation2 + $0xf0] sm:$0xf]  ;;  %v1591_v10 = vld [vmem:[#allocation2 + $0xf4] sm:$0xf0]  ;;  %678 = vmatpush.bf16.msra.mxu0 %v1154_v3  ;;  %v1273_v14 = vld [vmem:[#allocation2 + $0x160] sm:$0xf]  ;;  %v1146_v16 = vor.u32 %v1573_v13, %v1145_v11 }
   0x9   :  { %v1218_v12 = vor.u32 %v1591_v10, %v1217_v9  ;;  %v1605_v15 = vld [vmem:[#allocation2 + $0x164] sm:$0xf0]  ;;  %706 = vmatpush.bf16.msra.mxu2 %v1282_v7  ;;  %v1337_v18 = vld [vmem:[#allocation2 + $0x1e0] sm:$0xf]  ;;  %v1137_v23 = vld [vmem:[#allocation2 + $0x50] sm:$0xf] }
   0xa   :  { %720 = vmatpush.bf16.msra.mxu3 %v1346_v8  ;;  %v1274_v17 = vor.u32 %v1605_v15, %v1273_v14  ;;  %v1621_v19 = vld [vmem:[#allocation2 + $0x1e4] sm:$0xf0]  ;;  %v1209_v20 = vld [vmem:[#allocation2 + $0xe0] sm:$0xf]  ;;  %v1571_v24 = vld [vmem:[#allocation2 + $0x54] sm:$0xf0] }
   0xb   :  { %692 = vmatpush.bf16.msra.mxu1 %v1218_v12  ;;  %v1338_v21 = vor.u32 %v1621_v19, %v1337_v18  ;;  %v1589_v22 = vld [vmem:[#allocation2 + $0xe4] sm:$0xf0]  ;;  %v1265_v26 = vld [vmem:[#allocation2 + $0x150] sm:$0xf]  ;;  %v1603_v27 = vld [vmem:[#allocation2 + $0x154] sm:$0xf0]  ;;  %v1138_v29 = vor.u32 %v1571_v24, %v1137_v23 }
   0xc   :  { %v1210_v25 = vor.u32 %v1589_v22, %v1209_v20  ;;  %v1329_v28 = vld [vmem:[#allocation2 + $0x1d0] sm:$0xf]  ;;  %679 = vmatpush.bf16.msra.mxu0 %v1146_v16  ;;  %v1619_v30 = vld [vmem:[#allocation2 + $0x1d4] sm:$0xf0]  ;;  %v1266_v33 = vor.u32 %v1603_v27, %v1265_v26  ;;  %v1129_v35 = vld [vmem:[#allocation2 + $0x40] sm:$0xf] }
   0xd   :  { %v1201_v31 = vld [vmem:[#allocation2 + $0xd0] sm:$0xf]  ;;  %v1587_v32 = vld [vmem:[#allocation2 + $0xd4] sm:$0xf0]  ;;  %707 = vmatpush.bf16.msra.mxu2 %v1274_v17  ;;  %v1330_v34 = vor.u32 %v1619_v30, %v1329_v28  ;;  %v1569_v36 = vld [vmem:[#allocation2 + $0x44] sm:$0xf0] }
   0xe   :  { %721 = vmatpush.bf16.msra.mxu3 %v1338_v21  ;;  %v1257_v37 = vld [vmem:[#allocation2 + $0x140] sm:$0xf]  ;;  %v1202_v38 = vor.u32 %v1587_v32, %v1201_v31  ;;  %v1601_v39 = vld [vmem:[#allocation2 + $0x144] sm:$0xf0]  ;;  %v1130_v44 = vor.u32 %v1569_v36, %v1129_v35  ;;  %v1121_v47 = vld [vmem:[#allocation2 + $0x30] sm:$0xf] }
   0xf   :  { %693 = vmatpush.bf16.msra.mxu1 %v1210_v25  ;;  %v1321_v40 = vld [vmem:[#allocation2 + $0x1c0] sm:$0xf]  ;;  %v1617_v41 = vld [vmem:[#allocation2 + $0x1c4] sm:$0xf0]  ;;  %v1258_v45 = vor.u32 %v1601_v39, %v1257_v37  ;;  %v1567_v48 = vld [vmem:[#allocation2 + $0x34] sm:$0xf0] }
  0x10   :  { %v1193_v42 = vld [vmem:[#allocation2 + $0xc0] sm:$0xf]  ;;  %v1585_v43 = vld [vmem:[#allocation2 + $0xc4] sm:$0xf0]  ;;  %680 = vmatpush.bf16.msra.mxu0 %v1138_v29  ;;  %v1322_v46 = vor.u32 %v1617_v41, %v1321_v40  ;;  %v1249_v49 = vld [vmem:[#allocation2 + $0x130] sm:$0xf]  ;;  %v1122_v56 = vor.u32 %v1567_v48, %v1121_v47 }
  0x11   :  { %708 = vmatpush.bf16.msra.mxu2 %v1266_v33  ;;  %v1194_v50 = vor.u32 %v1585_v43, %v1193_v42  ;;  %v1599_v51 = vld [vmem:[#allocation2 + $0x134] sm:$0xf0]  ;;  %v1313_v52 = vld [vmem:[#allocation2 + $0x1b0] sm:$0xf]  ;;  %v1113_v59 = vld [vmem:[#allocation2 + $0x20] sm:$0xf] }
  0x12   :  { %722 = vmatpush.bf16.msra.mxu3 %v1330_v34  ;;  %v1615_v53 = vld [vmem:[#allocation2 + $0x1b4] sm:$0xf0]  ;;  %v1185_v54 = vld [vmem:[#allocation2 + $0xb0] sm:$0xf]  ;;  %v1250_v57 = vor.u32 %v1599_v51, %v1249_v49  ;;  %v1565_v60 = vld [vmem:[#allocation2 + $0x24] sm:$0xf0] }
  0x13   :  { %694 = vmatpush.bf16.msra.mxu1 %v1202_v38  ;;  %v1583_v55 = vld [vmem:[#allocation2 + $0xb4] sm:$0xf0]  ;;  %v1314_v58 = vor.u32 %v1615_v53, %v1313_v52  ;;  %v1241_v61 = vld [vmem:[#allocation2 + $0x120] sm:$0xf]  ;;  %v1597_v63 = vld [vmem:[#allocation2 + $0x124] sm:$0xf0]  ;;  %v1114_v4 = vor.u32 %v1565_v60, %v1113_v59 }
  0x14   :  { %681 = vmatpush.bf16.msra.mxu0 %v1130_v44  ;;  %v1186_v62 = vor.u32 %v1583_v55, %v1185_v54  ;;  %v1305_v0 = vld [vmem:[#allocation2 + $0x1a0] sm:$0xf]  ;;  %v1613_v1 = vld [vmem:[#allocation2 + $0x1a4] sm:$0xf0]  ;;  %v1105_v5 = vld [vmem:[#allocation2 + $0x10] sm:$0xf]  ;;  %v1242_v6 = vor.u32 %v1597_v63, %v1241_v61 }
  0x15   :  { %709 = vmatpush.bf16.msra.mxu2 %v1258_v45  ;;  %v1177_v2 = vld [vmem:[#allocation2 + $0xa0] sm:$0xf]  ;;  %v1581_v3 = vld [vmem:[#allocation2 + $0xa4] sm:$0xf0]  ;;  %v1306_v7 = vor.u32 %v1613_v1, %v1305_v0  ;;  %v1563_v8 = vld [vmem:[#allocation2 + $0x14] sm:$0xf0] }
  0x16   :  { %723 = vmatpush.bf16.msra.mxu3 %v1322_v46  ;;  %v1233_v9 = vld [vmem:[#allocation2 + $0x110] sm:$0xf]  ;;  %v1595_v10 = vld [vmem:[#allocation2 + $0x114] sm:$0xf0]  ;;  %v1178_v11 = vor.u32 %v1581_v3, %v1177_v2  ;;  %v1097_v16 = vld [vmem:[#allocation2] sm:$0xf]  ;;  %v1106_v18 = vor.u32 %v1563_v8, %v1105_v5 }
  0x17   :  { %695 = vmatpush.bf16.msra.mxu1 %v1194_v50  ;;  %v1297_v12 = vld [vmem:[#allocation2 + $0x190] sm:$0xf]  ;;  %v1611_v13 = vld [vmem:[#allocation2 + $0x194] sm:$0xf0]  ;;  %v1561_v17 = vld [vmem:[#allocation2 + $0x4] sm:$0xf0]  ;;  %v1234_v23 = vor.u32 %v1595_v10, %v1233_v9 }
  0x18   :  { %682 = vmatpush.bf16.msra.mxu0 %v1122_v56  ;;  %v1169_v14 = vld [vmem:[#allocation2 + $0x90] sm:$0xf]  ;;  %v1579_v15 = vld [vmem:[#allocation2 + $0x94] sm:$0xf0]  ;;  %v1225_v19 = vld [vmem:[#allocation2 + $0x100] sm:$0xf]  ;;  %v1298_v24 = vor.u32 %v1611_v13, %v1297_v12  ;;  %v1098_v35 = vor.u32 %v1561_v17, %v1097_v16 }
  0x19   :  { %710 = vmatpush.bf16.msra.mxu2 %v1250_v57  ;;  %v1593_v20 = vld [vmem:[#allocation2 + $0x104] sm:$0xf0]  ;;  %v1289_v21 = vld [vmem:[#allocation2 + $0x180] sm:$0xf]  ;;  %v1409_v25 = vld [vmem:[#allocation2 + $0x270] sm:$0xf]  ;;  %v1170_v28 = vor.u32 %v1579_v15, %v1169_v14 }
  0x1a   :  { %724 = vmatpush.bf16.msra.mxu3 %v1314_v58  ;;  %v1609_v22 = vld [vmem:[#allocation2 + $0x184] sm:$0xf0]  ;;  %v1639_v26 = vld [vmem:[#allocation2 + $0x274] sm:$0xf0]  ;;  %v1574_v27 = vld [vmem:[#allocation2 + $0x74] sm:$0xf]  ;;  %v1226_v39 = vor.u32 %v1593_v20, %v1225_v19 }
  0x1b   :  { %696 = vmatpush.bf16.msra.mxu1 %v1186_v62  ;;  %v1155_v29 = vld [vmem:[#allocation2 + $0x78] sm:$0xf0]  ;;  %v1161_v30 = vld [vmem:[#allocation2 + $0x80] sm:$0xf]  ;;  %v1577_v31 = vld [vmem:[#allocation2 + $0x84] sm:$0xf0]  ;;  %v1290_v40 = vor.u32 %v1609_v22, %v1289_v21  ;;  %v1410_v44 = vor.u32 %v1639_v26, %v1409_v25 }
  0x1c   :  { %683 = vmatpush.bf16.msra.mxu0 %v1114_v4  ;;  %v1077_v32 = vld [vmem:[%s1880_s0 + $0x8] sm:$0xf]  ;;  %v1557_v33 = vld [vmem:[%s1880_s0 + $0x20] sm:$0xf0]  ;;  %v1473_v34 = vld [vmem:[#allocation2 + $0x2f0] sm:$0xf]  ;;  %v1158_v45 = vor.u32 %v1574_v27, %v1155_v29  ;;  %v1162_v49 = vor.u32 %v1577_v31, %v1161_v30 }
  0x1d   :  { %711 = vmatpush.bf16.msra.mxu2 %v1242_v6  ;;  %v1655_v36 = vld [vmem:[#allocation2 + $0x2f4] sm:$0xf0]  ;;  %v1481_v37 = vld [vmem:[#allocation2 + $0x300] sm:$0xf]  ;;  %v1657_v38 = vld [vmem:[#allocation2 + $0x304] sm:$0xf0]  ;;  %v1766_v54 = vor.u32 %v1557_v33, %v1077_v32 }
  0x1e   :  { %725 = vmatpush.bf16.msra.mxu3 %v1306_v7  ;;  %v1590_v41 = vld [vmem:[#allocation2 + $0xf4] sm:$0xf]  ;;  %v1219_v42 = vld [vmem:[#allocation2 + $0xf8] sm:$0xf0]  ;;  %v1069_v43 = vld [vmem:[%s1880_s0] sm:$0xf]  ;;  %v1482_v50 = vor.u32 %v1657_v38, %v1481_v37  ;;  %v1474_v55 = vor.u32 %v1655_v36, %v1473_v34 }
  0x1f   :  { %697 = vmatpush.bf16.msra.mxu1 %v1178_v11  ;;  %v1556_v46 = vld [vmem:[%s1880_s0 + $0x18] sm:$0xf0]  ;;  %v1554_v47 = vld [vmem:[%s1880_s0 + $0xc] sm:$0xf]  ;;  %v1079_v48 = vld [vmem:[%s1880_s0 + $0x24] sm:$0xf0]  ;;  %v1222_v59 = vor.u32 %v1590_v41, %v1219_v42 }
  0x20   :  { %684 = vmatpush.bf16.msra.mxu0 %v1106_v18  ;;  %v1401_v51 = vld [vmem:[#allocation2 + $0x260] sm:$0xf]  ;;  %v1637_v52 = vld [vmem:[#allocation2 + $0x264] sm:$0xf0]  ;;  %v1572_v53 = vld [vmem:[#allocation2 + $0x64] sm:$0xf]  ;;  %v1774_v60 = vor.u32 %v1556_v46, %v1069_v43  ;;  %v1776_v63 = vor.u32 %v1554_v47, %v1079_v48 }
  0x21   :  { %712 = vmatpush.bf16.msra.mxu2 %v1234_v23  ;;  %v1147_v56 = vld [vmem:[#allocation2 + $0x68] sm:$0xf0]  ;;  %v1553_v57 = vld [vmem:[%s1880_s0 + $0x4] sm:$0xf]  ;;  %v1071_v58 = vld [vmem:[%s1880_s0 + $0x1c] sm:$0xf0]  ;;  %v1402_v0 = vor.u32 %v1637_v52, %v1401_v51 }
  0x22   :  { %726 = vmatpush.bf16.msra.mxu3 %v1298_v24  ;;  %v1465_v61 = vld [vmem:[#allocation2 + $0x2e0] sm:$0xf]  ;;  %v1653_v62 = vld [vmem:[#allocation2 + $0x2e4] sm:$0xf0]  ;;  %v1588_v1 = vld [vmem:[#allocation2 + $0xe4] sm:$0xf]  ;;  %v1150_v3 = vor.u32 %v1572_v53, %v1147_v56  ;;  %v1778_v4 = vor.u32 %v1553_v57, %v1071_v58 }
  0x23   :  { %698 = vmatpush.bf16.msra.mxu1 %v1170_v28  ;;  %v1211_v2 = vld [vmem:[#allocation2 + $0xe8] sm:$0xf0]  ;;  %v1393_v5 = vld [vmem:[#allocation2 + $0x250] sm:$0xf]  ;;  %v1635_v6 = vld [vmem:[#allocation2 + $0x254] sm:$0xf0]  ;;  %v1466_v7 = vor.u32 %v1653_v62, %v1465_v61 }
  0x24   :  { %685 = vmatpush.bf16.msra.mxu0 %v1098_v35  ;;  %v1570_v8 = vld [vmem:[#allocation2 + $0x54] sm:$0xf]  ;;  %v1139_v9 = vld [vmem:[#allocation2 + $0x58] sm:$0xf0]  ;;  %v1214_v10 = vor.u32 %v1588_v1, %v1211_v2  ;;  %v1457_v11 = vld [vmem:[#allocation2 + $0x2d0] sm:$0xf]  ;;  %v1394_v13 = vor.u32 %v1635_v6, %v1393_v5 }
  0x25   :  { %713 = vmatpush.bf16.msra.mxu2 %v1226_v39  ;;  %v1651_v12 = vld [vmem:[#allocation2 + $0x2d4] sm:$0xf0]  ;;  %v1586_v14 = vld [vmem:[#allocation2 + $0xd4] sm:$0xf]  ;;  %v1203_v15 = vld [vmem:[#allocation2 + $0xd8] sm:$0xf0]  ;;  %v1142_v16 = vor.u32 %v1570_v8, %v1139_v9 }
  0x26   :  { %727 = vmatpush.bf16.msra.mxu3 %v1290_v40  ;;  %v1385_v17 = vld [vmem:[#allocation2 + $0x240] sm:$0xf]  ;;  %v1633_v18 = vld [vmem:[#allocation2 + $0x244] sm:$0xf0]  ;;  %v1458_v19 = vor.u32 %v1651_v12, %v1457_v11  ;;  %v1568_v20 = vld [vmem:[#allocation2 + $0x44] sm:$0xf]  ;;  %v1206_v22 = vor.u32 %v1586_v14, %v1203_v15 }
  0x27   :  { %699 = vmatpush.bf16.msra.mxu1 %v1162_v49  ;;  %686 = vmatmul.bf16.vlgmr.msra.gmra.mxu0 %v1774_v60  ;;  %v1131_v21 = vld [vmem:[#allocation2 + $0x48] sm:$0xf0]  ;;  %v1449_v23 = vld [vmem:[#allocation2 + $0x2c0] sm:$0xf]  ;;  %v1649_v24 = vld [vmem:[#allocation2 + $0x2c4] sm:$0xf0]  ;;  %v1386_v25 = vor.u32 %v1633_v18, %v1385_v17 }
  0x28   :  { %734 = vmatpush.bf16.msrb.mxu0 %v1410_v44  ;;  %714 = vmatmul.bf16.vlgmr.msra.gmra.mxu2 %v1766_v54  ;;  %v1584_v26 = vld [vmem:[#allocation2 + $0xc4] sm:$0xf]  ;;  %v1195_v27 = vld [vmem:[#allocation2 + $0xc8] sm:$0xf0]  ;;  %v1134_v28 = vor.u32 %v1568_v20, %v1131_v21  ;;  %v1377_v29 = vld [vmem:[#allocation2 + $0x230] sm:$0xf]  ;;  %v1450_v31 = vor.u32 %v1649_v24, %v1449_v23 }
  0x29   :  { %769 = vmatpush.bf16.msrb.mxu2 %v1482_v50  ;;  %728 = vmatmul.bf16.vlgmr.msra.gmra.mxu3 %v1776_v63  ;;  %v1631_v30 = vld [vmem:[#allocation2 + $0x234] sm:$0xf0]  ;;  %v1566_v32 = vld [vmem:[#allocation2 + $0x34] sm:$0xf]  ;;  %v1123_v33 = vld [vmem:[#allocation2 + $0x38] sm:$0xf0]  ;;  %v1198_v35 = vor.u32 %v1584_v26, %v1195_v27 }
  0x2a   :  { %776 = vmatpush.bf16.msrb.mxu3 %v1158_v45  ;;  %700 = vmatmul.bf16.vlgmr.msra.gmra.mxu1 %v1778_v4  ;;  %v1441_v34 = vld [vmem:[#allocation2 + $0x2b0] sm:$0xf]  ;;  %v1647_v36 = vld [vmem:[#allocation2 + $0x2b4] sm:$0xf0]  ;;  %v1559_v38 = vld [vmem:[%s1880_s0 + $0x30] sm:$0xf0]  ;;  %v1378_v39 = vor.u32 %v1631_v30, %v1377_v29  ;;  %v1126_v42 = vor.u32 %v1566_v32, %v1123_v33 }
  0x2b   :  { %748 = vmatpush.bf16.msrb.mxu1 %v1474_v55  ;;  %v1093_v37 = vld [vmem:[%s1880_s0 + $0x18] sm:$0xf]  ;;  %v1582_v40 = vld [vmem:[#allocation2 + $0xb4] sm:$0xf]  ;;  %v1187_v41 = vld [vmem:[#allocation2 + $0xb8] sm:$0xf0]  ;;  %v1442_v45 = vor.u32 %v1647_v36, %v1441_v34 }
  0x2c   :  { %735 = vmatpush.bf16.msrb.mxu0 %v1402_v0  ;;  %v1369_v43 = vld [vmem:[#allocation2 + $0x220] sm:$0xf]  ;;  %v1629_v44 = vld [vmem:[#allocation2 + $0x224] sm:$0xf0]  ;;  %v1564_v46 = vld [vmem:[#allocation2 + $0x24] sm:$0xf]  ;;  %v1790_v48 = vor.u32 %v1559_v38, %v1093_v37  ;;  %v1190_v49 = vor.u32 %v1582_v40, %v1187_v41 }
  0x2d   :  { %790 = vmatpush.bf16.msra.mxu2 %v1222_v59  ;;  %v1115_v47 = vld [vmem:[#allocation2 + $0x28] sm:$0xf0]  ;;  %v1433_v50 = vld [vmem:[#allocation2 + $0x2a0] sm:$0xf]  ;;  %v1645_v51 = vld [vmem:[#allocation2 + $0x2a4] sm:$0xf0]  ;;  %v1370_v52 = vor.u32 %v1629_v44, %v1369_v43 }
  0x2e   :  { %777 = vmatpush.bf16.msrb.mxu3 %v1150_v3  ;;  %vm674_vm0 = vcmask 130048   ;;  %v1580_v53 = vld [vmem:[#allocation2 + $0xa4] sm:$0xf]  ;;  %v1179_v55 = vld [vmem:[#allocation2 + $0xa8] sm:$0xf0]  ;;  %v1118_v56 = vor.u32 %v1564_v46, %v1115_v47  ;;  %v1434_v61 = vor.u32 %v1645_v51, %v1433_v50 }
  0x2f   :  { %749 = vmatpush.bf16.msrb.mxu1 %v1466_v7  ;;  %v1361_v57 = vld [vmem:[#allocation2 + $0x210] sm:$0xf]  ;;  %v1627_v58 = vld [vmem:[#allocation2 + $0x214] sm:$0xf0]  ;;  %v1562_v59 = vld [vmem:[#allocation2 + $0x14] sm:$0xf]  ;;  %v1182_v2 = vor.u32 %v1580_v53, %v1179_v55 }
  0x30   :  { %736 = vmatpush.bf16.msrb.mxu0 %v1394_v13  ;;  %v1107_v62 = vld [vmem:[#allocation2 + $0x18] sm:$0xf0]  ;;  %v1425_v0 = vld [vmem:[#allocation2 + $0x290] sm:$0xf]  ;;  %v1643_v1 = vld [vmem:[#allocation2 + $0x294] sm:$0xf0]  ;;  %v1362_v7 = vor.u32 %v1627_v58, %v1361_v57 }
  0x31   :  { %791 = vmatpush.bf16.msra.mxu2 %v1214_v10  ;;  %v1578_v3 = vld [vmem:[#allocation2 + $0x94] sm:$0xf]  ;;  %v1171_v5 = vld [vmem:[#allocation2 + $0x98] sm:$0xf0]  ;;  %v1353_v6 = vld [vmem:[#allocation2 + $0x200] sm:$0xf]  ;;  %v1110_v11 = vor.u32 %v1562_v59, %v1107_v62  ;;  %v1426_v15 = vor.u32 %v1643_v1, %v1425_v0 }
  0x32   :  { %778 = vmatpush.bf16.msrb.mxu3 %v1142_v16  ;;  %v1625_v8 = vld [vmem:[#allocation2 + $0x204] sm:$0xf0]  ;;  %v1560_v9 = vld [vmem:[#allocation2 + $0x4] sm:$0xf]  ;;  %v1099_v10 = vld [vmem:[#allocation2 + $0x8] sm:$0xf0] }
  0x33   :  { %750 = vmatpush.bf16.msrb.mxu1 %v1458_v19  ;;  %v1606_v12 = vld [vmem:[#allocation2 + $0x174] sm:$0xf]  ;;  %v1283_v13 = vld [vmem:[#allocation2 + $0x178] sm:$0xf0]  ;;  %v1417_v17 = vld [vmem:[#allocation2 + $0x280] sm:$0xf]  ;;  %v1174_v19 = vor.u32 %v1578_v3, %v1171_v5  ;;  %v1354_v23 = vor.u32 %v1625_v8, %v1353_v6  ;;  %v1102_v27 = vor.u32 %v1560_v9, %v1099_v10 }
  0x34   :  { %737 = vmatpush.bf16.msrb.mxu0 %v1386_v25  ;;  %v1638_v14 = vld [vmem:[#allocation2 + $0x274] sm:$0xf]  ;;  %v1411_v16 = vld [vmem:[#allocation2 + $0x278] sm:$0xf0]  ;;  %v1641_v18 = vld [vmem:[#allocation2 + $0x284] sm:$0xf0] }
  0x35   :  { %792 = vmatpush.bf16.msra.mxu2 %v1206_v22  ;;  %v1085_v20 = vld [vmem:[%s1880_s0 + $0x10] sm:$0xf]  ;;  %v1558_v21 = vld [vmem:[%s1880_s0 + $0x28] sm:$0xf0]  ;;  %v1576_v22 = vld [vmem:[#allocation2 + $0x84] sm:$0xf]  ;;  %v1414_v32 = vor.u32 %v1638_v14, %v1411_v16  ;;  %v1418_v33 = vor.u32 %v1641_v18, %v1417_v17 }
  0x36   :  { %779 = vmatpush.bf16.msrb.mxu3 %v1134_v28  ;;  %v1163_v24 = vld [vmem:[#allocation2 + $0x88] sm:$0xf0]  ;;  %v1622_v25 = vld [vmem:[#allocation2 + $0x1f4] sm:$0xf]  ;;  %v1347_v26 = vld [vmem:[#allocation2 + $0x1f8] sm:$0xf0]  ;;  %v1286_v28 = vor.u32 %v1606_v12, %v1283_v13  ;;  %v1806_v37 = vor.u32 %v1558_v21, %v1085_v20 }
  0x37   :  { %751 = vmatpush.bf16.msrb.mxu1 %v1450_v31  ;;  %v1654_v29 = vld [vmem:[#allocation2 + $0x2f4] sm:$0xf]  ;;  %v1475_v30 = vld [vmem:[#allocation2 + $0x2f8] sm:$0xf0]  ;;  %v1087_v34 = vld [vmem:[%s1880_s0 + $0x2c] sm:$0xf0]  ;;  %v1166_v38 = vor.u32 %v1576_v22, %v1163_v24  ;;  %v1350_v41 = vor.u32 %v1622_v25, %v1347_v26 }
  0x38   :  { %738 = vmatpush.bf16.msrb.mxu0 %v1378_v39  ;;  %1487 = vmatmul.msk.bf16.vlgmr.msrb.gmra.mxu2 %vm674_vm0, %v1790_v48  ;;  %v1555_v31 = vld [vmem:[%s1880_s0 + $0x14] sm:$0xf]  ;;  %v1275_v36 = vld [vmem:[#allocation2 + $0x168] sm:$0xf0]  ;;  %v1636_v39 = vld [vmem:[#allocation2 + $0x264] sm:$0xf] }
  0x39   :  { %793 = vmatpush.bf16.msra.mxu2 %v1198_v35  ;;  %v1604_v35 = vld [vmem:[#allocation2 + $0x164] sm:$0xf]  ;;  %v1403_v40 = vld [vmem:[#allocation2 + $0x268] sm:$0xf0]  ;;  %v1808_v44 = vor.u32 %v1555_v31, %v1087_v34  ;;  %v1602_v51 = vld [vmem:[#allocation2 + $0x154] sm:$0xf] }
  0x3a   :  { %780 = vmatpush.bf16.msrb.mxu3 %v1126_v42  ;;  %v1478_v42 = vor.u32 %v1654_v29, %v1475_v30  ;;  %v1620_v43 = vld [vmem:[#allocation2 + $0x1e4] sm:$0xf]  ;;  %v1339_v46 = vld [vmem:[#allocation2 + $0x1e8] sm:$0xf0]  ;;  %v1406_v50 = vor.u32 %v1636_v39, %v1403_v40  ;;  %v1634_v53 = vld [vmem:[#allocation2 + $0x254] sm:$0xf] }
  0x3b   :  { %752 = vmatpush.bf16.msrb.mxu1 %v1442_v45  ;;  %v1278_v45 = vor.u32 %v1604_v35, %v1275_v36  ;;  %v1652_v47 = vld [vmem:[#allocation2 + $0x2e4] sm:$0xf]  ;;  %v1395_v55 = vld [vmem:[#allocation2 + $0x258] sm:$0xf0]  ;;  %v1618_v58 = vld [vmem:[#allocation2 + $0x1d4] sm:$0xf] }
  0x3c   :  { %739 = vmatpush.bf16.msrb.mxu0 %v1370_v52  ;;  %v1267_v52 = vld [vmem:[#allocation2 + $0x158] sm:$0xf0]  ;;  %v1650_v62 = vld [vmem:[#allocation2 + $0x2d4] sm:$0xf]  ;;  %v1398_v1 = vor.u32 %v1634_v53, %v1395_v55  ;;  %v1259_v3 = vld [vmem:[#allocation2 + $0x148] sm:$0xf0] }
  0x3d   :  { %794 = vmatpush.bf16.msra.mxu2 %v1190_v49  ;;  %v1467_v49 = vld [vmem:[#allocation2 + $0x2e8] sm:$0xf0]  ;;  %v1270_v59 = vor.u32 %v1602_v51, %v1267_v52  ;;  %v1459_v0 = vld [vmem:[#allocation2 + $0x2d8] sm:$0xf0]  ;;  %v1632_v5 = vld [vmem:[#allocation2 + $0x244] sm:$0xf] }
  0x3e   :  { %781 = vmatpush.bf16.msrb.mxu3 %v1118_v56  ;;  %v1342_v56 = vor.u32 %v1620_v43, %v1339_v46  ;;  %v1470_v57 = vor.u32 %v1652_v47, %v1467_v49  ;;  %v1387_v6 = vld [vmem:[#allocation2 + $0x248] sm:$0xf0]  ;;  %v1462_v8 = vor.u32 %v1650_v62, %v1459_v0  ;;  %v1616_v9 = vld [vmem:[#allocation2 + $0x1c4] sm:$0xf]  ;;  %v1251_v16 = vld [vmem:[#allocation2 + $0x138] sm:$0xf0] }
  0x3f   :  { %753 = vmatpush.bf16.msrb.mxu1 %v1434_v61  ;;  %v1331_v61 = vld [vmem:[#allocation2 + $0x1d8] sm:$0xf0]  ;;  %v1323_v10 = vld [vmem:[#allocation2 + $0x1c8] sm:$0xf0]  ;;  %v1648_v12 = vld [vmem:[#allocation2 + $0x2c4] sm:$0xf]  ;;  %v1390_v14 = vor.u32 %v1632_v5, %v1387_v6 }
  0x40   :  { %740 = vmatpush.bf16.msrb.mxu0 %v1362_v7  ;;  %v1334_v7 = vor.u32 %v1618_v58, %v1331_v61  ;;  %v1451_v13 = vld [vmem:[#allocation2 + $0x2c8] sm:$0xf0]  ;;  %v1630_v17 = vld [vmem:[#allocation2 + $0x234] sm:$0xf]  ;;  %v1326_v18 = vor.u32 %v1616_v9, %v1323_v10  ;;  %v1315_v21 = vld [vmem:[#allocation2 + $0x1b8] sm:$0xf0] }
  0x41   :  { %795 = vmatpush.bf16.msra.mxu2 %v1182_v2  ;;  %v1600_v2 = vld [vmem:[#allocation2 + $0x144] sm:$0xf]  ;;  %v1646_v22 = vld [vmem:[#allocation2 + $0x2b4] sm:$0xf]  ;;  %v1243_v26 = vld [vmem:[#allocation2 + $0x128] sm:$0xf0] }
  0x42   :  { %782 = vmatpush.bf16.msrb.mxu3 %v1110_v11  ;;  %v1262_v11 = vor.u32 %v1600_v2, %v1259_v3  ;;  %v1596_v25 = vld [vmem:[#allocation2 + $0x124] sm:$0xf]  ;;  %v1435_v35 = vld [vmem:[#allocation2 + $0x2a8] sm:$0xf0]  ;;  %v1235_v39 = vld [vmem:[#allocation2 + $0x118] sm:$0xf0] }
  0x43   :  { %754 = vmatpush.bf16.msrb.mxu1 %v1426_v15  ;;  %v1598_v15 = vld [vmem:[#allocation2 + $0x134] sm:$0xf]  ;;  %v1612_v31 = vld [vmem:[#allocation2 + $0x1a4] sm:$0xf]  ;;  %v1299_v47 = vld [vmem:[#allocation2 + $0x198] sm:$0xf0] }
  0x44   :  { %741 = vmatpush.bf16.msrb.mxu0 %v1354_v23  ;;  %v1254_v20 = vor.u32 %v1598_v15, %v1251_v16  ;;  %v1443_v23 = vld [vmem:[#allocation2 + $0x2b8] sm:$0xf0]  ;;  %v1644_v34 = vld [vmem:[#allocation2 + $0x2a4] sm:$0xf]  ;;  %v1626_v40 = vld [vmem:[#allocation2 + $0x214] sm:$0xf] }
  0x45   :  { %796 = vmatpush.bf16.msra.mxu2 %v1174_v19  ;;  %v1614_v19 = vld [vmem:[#allocation2 + $0x1b4] sm:$0xf]  ;;  %v1446_v30 = vor.u32 %v1646_v22, %v1443_v23  ;;  %v1438_v43 = vor.u32 %v1644_v34, %v1435_v35  ;;  %v1592_v52 = vld [vmem:[#allocation2 + $0x104] sm:$0xf]  ;;  %v1227_v53 = vld [vmem:[#allocation2 + $0x108] sm:$0xf0] }
  0x46   :  { %783 = vmatpush.bf16.msrb.mxu3 %v1102_v27  ;;  %v1628_v27 = vld [vmem:[#allocation2 + $0x224] sm:$0xf]  ;;  %v1318_v29 = vor.u32 %v1614_v19, %v1315_v21  ;;  %v1642_v49 = vld [vmem:[#allocation2 + $0x294] sm:$0xf]  ;;  %v1483_v58 = vld [vmem:[#allocation2 + $0x308] sm:$0xf0]  ;;  %v1230_v62 = vor.u32 %v1592_v52, %v1227_v53 }
  0x47   :  { %755 = vmatpush.bf16.msrb.mxu1 %v1418_v33  ;;  %742 = vmatmul.bf16.vlgmr.msrb.gmra.mxu0 %v1806_v37  ;;  %v1307_v33 = vld [vmem:[#allocation2 + $0x1a8] sm:$0xf0]  ;;  %v1624_v55 = vld [vmem:[#allocation2 + $0x204] sm:$0xf]  ;;  %v1665_v9 = vld [vmem:[%s1883_s3 + $0x38] sm:$0xff] }
  0x48   :  { %804 = vmatpush.bf16.msra.mxu0 %v1286_v28  ;;  %v1371_v28 = vld [vmem:[#allocation2 + $0x228] sm:$0xf0]  ;;  %v1608_v0 = vld [vmem:[#allocation2 + $0x184] sm:$0xf]  ;;  %v1664_v10 = vld [vmem:[%s1883_s3 + $0x30] sm:$0xff] }
  0x49   :  { %797 = vmatpush.bf16.msra.mxu2 %v1166_v38  ;;  %784 = vmatmul.bf16.vlgmr.msrb.gmra.mxu3 %v1774_v60  ;;  %v1454_v60 = vor.u32 %v1648_v12, %v1451_v13  ;;  %v1374_v36 = vor.u32 %v1628_v27, %v1371_v28  ;;  %v1594_v38 = vld [vmem:[#allocation2 + $0x114] sm:$0xf]  ;;  %v1640_v3 = vld [vmem:[#allocation2 + $0x284] sm:$0xf]  ;;  %v1419_v5 = vld [vmem:[#allocation2 + $0x288] sm:$0xf0] }
  0x4a   :  { %832 = vmatpush.bf16.msra.mxu3 %v1414_v32  ;;  %756 = vmatmul.bf16.vlgmr.msrb.gmra.mxu1 %v1808_v44  ;;  %v1246_v32 = vor.u32 %v1596_v25, %v1243_v26  ;;  %v1238_v46 = vor.u32 %v1594_v38, %v1235_v39  ;;  %v1673_v22 = vld [vmem:[%s1883_s3 + $0x78] sm:$0xff]  ;;  %v1672_v27 = vld [vmem:[%s1883_s3 + $0x70] sm:$0xff]  ;;  %v1670_v38 = vld [vmem:[%s1883_s3 + $0x60] sm:$0xff] }
  0x4b   :  { %818 = vmatpush.bf16.msra.mxu1 %v1350_v41  ;;  %v1363_v41 = vld [vmem:[#allocation2 + $0x218] sm:$0xf0]  ;;  %v1667_v53 = vld [vmem:[%s1883_s3 + $0x48] sm:$0xff] }
  0x4c   :  { %805 = vmatpush.bf16.msra.mxu0 %v1278_v45  ;;  %798 = vmatmul.bf16.vlgmr.msra.gmra.mxu2 %v1778_v4  ;;  %v1379_v4 = vld [vmem:[#allocation2 + $0x238] sm:$0xf0]  ;;  %v1610_v45 = vld [vmem:[#allocation2 + $0x194] sm:$0xf]  ;;  %v1366_v51 = vor.u32 %v1626_v40, %v1363_v41 }
  0x4d   :  { %846 = vmatpush.bf16.msrb.mxu2 %v1478_v42  ;;  %v1382_v24 = vor.u32 %v1630_v17, %v1379_v4  ;;  %v1310_v42 = vor.u32 %v1612_v31, %v1307_v33  ;;  %v1671_v33 = vld [vmem:[%s1883_s3 + $0x68] sm:$0xff] }
  0x4e   :  { %833 = vmatpush.bf16.msra.mxu3 %v1406_v50  ;;  %v1427_v50 = vld [vmem:[#allocation2 + $0x298] sm:$0xf0] }
  0x4f   :  { %819 = vmatpush.bf16.msra.mxu1 %v1342_v56  ;;  %v1355_v56 = vld [vmem:[#allocation2 + $0x208] sm:$0xf0]  ;;  %v1430_v61 = vor.u32 %v1642_v49, %v1427_v50  ;;  %v1668_v50 = vld [vmem:[%s1883_s3 + $0x50] sm:$0xff] }
  0x50   :  { %806 = vmatpush.bf16.msra.mxu0 %v1270_v59  ;;  %v1302_v59 = vor.u32 %v1610_v45, %v1299_v47  ;;  %v1358_v2 = vor.u32 %v1624_v55, %v1355_v56  ;;  %v1669_v45 = vld [vmem:[%s1883_s3 + $0x58] sm:$0xff]  ;;  %v1666_v56 = vld [vmem:[%s1883_s3 + $0x40] sm:$0xff] }
  0x51   :  { %847 = vmatpush.bf16.msrb.mxu2 %v1470_v57  ;;  %v1656_v57 = vld [vmem:[#allocation2 + $0x304] sm:$0xf] }
  0x52   :  { %834 = vmatpush.bf16.msra.mxu3 %v1398_v1  ;;  %v1291_v1 = vld [vmem:[#allocation2 + $0x188] sm:$0xf0]  ;;  %v1486_v6 = vor.u32 %v1656_v57, %v1483_v58 }
  0x53   :  { %820 = vmatpush.bf16.msra.mxu1 %v1334_v7  ;;  %v1294_v7 = vor.u32 %v1608_v0, %v1291_v1 }
  0x54   :  { %807 = vmatpush.bf16.msra.mxu0 %v1262_v11  ;;  %v143_v11 = vld [vmem:[%s1882_s2] sm:$0x3] }
  0x55   :  { %848 = vmatpush.bf16.msrb.mxu2 %v1462_v8  ;;  %v1422_v8 = vor.u32 %v1640_v3, %v1419_v5  ;;  %v145_v16 = vperm.slane %v143_v11, 0  ;;  %v146_v57 = vperm.slane %v143_v11, 1 }
  0x56   :  { %835 = vmatpush.bf16.msra.mxu3 %v1390_v14  ;;  %v1658_v14 = vld [vmem:[%s1883_s3] sm:$0xff] }
  0x57   :  { %821 = vmatpush.bf16.msra.mxu1 %v1326_v18 }
  0x58   :  { %808 = vmatpush.bf16.msra.mxu0 %v1254_v20 }
  0x59   :  { %849 = vmatpush.bf16.msrb.mxu2 %v1454_v60 }
  0x5a   :  { %836 = vmatpush.bf16.msra.mxu3 %v1382_v24 }
  0x5b   :  { %822 = vmatpush.bf16.msra.mxu1 %v1318_v29 }
  0x5c   :  { %809 = vmatpush.bf16.msra.mxu0 %v1246_v32 }
  0x5d   :  { %850 = vmatpush.bf16.msrb.mxu2 %v1446_v30 }
  0x5e   :  { %837 = vmatpush.bf16.msra.mxu3 %v1374_v36 }
  0x5f   :  { %823 = vmatpush.bf16.msra.mxu1 %v1310_v42 }
  0x60   :  { %810 = vmatpush.bf16.msra.mxu0 %v1238_v46 }
  0x61   :  { %851 = vmatpush.bf16.msrb.mxu2 %v1438_v43 }
  0x62   :  { %838 = vmatpush.bf16.msra.mxu3 %v1366_v51 }
  0x63   :  { %824 = vmatpush.bf16.msra.mxu1 %v1302_v59 }
  0x64   :  { %811 = vmatpush.bf16.msra.mxu0 %v1230_v62 }
  0x65   :  { %852 = vmatpush.bf16.msrb.mxu2 %v1430_v61 }
  0x66   :  { %839 = vmatpush.bf16.msra.mxu3 %v1358_v2 }
  0x67   :  { %825 = vmatpush.bf16.msra.mxu1 %v1294_v7  ;;  %812 = vmatmul.bf16.vlgmr.msra.gmra.mxu0 %v1766_v54  ;;  %v1663_v54 = vld [vmem:[%s1883_s3 + $0x28] sm:$0xff] }
  0x68   :  { %867 = vmatpush.bf16.msrb.mxu0 %v1486_v6 }
  0x69   :  { %840 = vmatmul.bf16.vlgmr.msra.gmra.mxu3 %v1806_v37  ;;  %853 = vmatpush.bf16.msrb.mxu2 %v1422_v8  ;;  %v1660_v37 = vld [vmem:[%s1883_s3 + $0x10] sm:$0xff] }
  0x6a   :  { %826 = vmatmul.bf16.vlgmr.msra.gmra.mxu1 %v1776_v63  ;;  %v1662_v63 = vld [vmem:[%s1883_s3 + $0x20] sm:$0xff]  ;;  %1026 = vmatpush.bf16.msrb.mxu3 %v1673_v22 }
  0x6b   :  { %1012 = vmatpush.bf16.msrb.mxu1 %v1665_v9 }
  0x6c   :  { %854 = vmatmul.bf16.vlgmr.msrb.gmra.mxu2 %v1808_v44  ;;  %v1659_v44 = vld [vmem:[%s1883_s3 + $0x8] sm:$0xff] }
  0x6e   :  { %1027 = vmatpush.bf16.msrb.mxu3 %v1672_v27 }
  0x6f   :  { %1013 = vmatpush.bf16.msrb.mxu1 %v1664_v10 }
  0x72   :  { %1028 = vmatpush.bf16.msrb.mxu3 %v1671_v33 }
  0x73   :  { %1014 = vmatpush.bf16.msrb.mxu1 %v1663_v54 }
  0x76   :  { %1029 = vmatpush.bf16.msrb.mxu3 %v1670_v38 }
  0x77   :  { %1488 = vmatmul.msk.bf16.vlgmr.msrb.gmra.mxu0 %vm674_vm0, %v1790_v48  ;;  %1015 = vmatpush.bf16.msrb.mxu1 %v1662_v63  ;;  %v1661_v48 = vld [vmem:[%s1883_s3 + $0x18] sm:$0xff] }
  0x7a   :  { %1030 = vmatpush.bf16.msrb.mxu3 %v1669_v45 }
  0x7b   :  { %1016 = vmatpush.bf16.msrb.mxu1 %v1661_v48 }
  0x7e   :  { %1031 = vmatpush.bf16.msrb.mxu3 %v1668_v50 }
  0x7f   :  { %1017 = vmatpush.bf16.msrb.mxu1 %v1660_v37 }
  0x82   :  { %1032 = vmatpush.bf16.msrb.mxu3 %v1667_v53 }
  0x83   :  { %1018 = vmatpush.bf16.msrb.mxu1 %v1659_v44 }
  0x86   :  { %1033 = vmatpush.bf16.msrb.mxu3 %v1666_v56 }
  0x87   :  { %1019 = vmatpush.bf16.msrb.mxu1 %v1658_v14 }
  0xa4   :  { %v687_v12 = vpop.f32.mrf.mxu0 }
  0xa5   :  { %v688_v17 = vadd.f32 %v687_v12, %v145_v16 }
  0xa7   :  { %v701_v15 = vpop.f32.mrf.mxu1 }
  0xa8   :  { %v702_v60 = vadd.f32 %v701_v15, %v688_v17 }
  0xab   :  { %v715_v13 = vpop.f32.mrf.mxu2 }
  0xac   :  { %v689_v4 = vpop.f32.mrf.mxu0  ;;  %v729_v19 = vpop.f32.mrf.mxu3  ;;  %v716_v23 = vadd.f32 %v715_v13, %v702_v60 }
  0xad   :  { %v690_v21 = vadd.f32 %v689_v4, %v145_v16 }
  0xae   :  { %v730_v28 = vadd.f32 %v729_v19, %v716_v23 }
  0xaf   :  { %v703_v20 = vpop.f32.mrf.mxu1 }
  0xb0   :  { %v704_v24 = vadd.f32 %v703_v20, %v690_v21  ;;  %v1677_v20 = vld [vmem:[%s1884_s4] ss:$0 sm:$0xff] }
  0xb3   :  { %v717_v18 = vpop.f32.mrf.mxu2 }
  0xb4   :  { %v718_v30 = vadd.f32 %v717_v18, %v704_v24  ;;  %v731_v32 = vpop.f32.mrf.mxu3 }
  0xb6   :  { %v732_v34 = vadd.f32 %v731_v32, %v718_v30 }
  0xbb   :  { %v771_v26 = vpop.f32.mrf.mxu2 }
  0xc3   :  { %v773_v41 = vpop.f32.mrf.mxu2 }
  0xc4   :  { %v743_v25 = vpop.f32.mrf.mxu0 }
  0xc5   :  { %v744_v31 = vadd.f32 %v743_v25, %v730_v28 }
  0xc7   :  { %v757_v29 = vpop.f32.mrf.mxu1 }
  0xc8   :  { %v758_v35 = vadd.f32 %v757_v29, %v744_v31 }
  0xca   :  { %v772_v42 = vadd.f32 %v771_v26, %v758_v35 }
  0xcc   :  { %v745_v36 = vpop.f32.mrf.mxu0  ;;  %v874_v47 = vmax.f32 %v772_v42, 0.0  ;;  %v785_v52 = vpop.f32.mrf.mxu3 }
  0xcd   :  { %v746_v39 = vadd.f32 %v745_v36, %v732_v34  ;;  %v786_v62 = vadd.f32 %v785_v52, %v146_v57 }
  0xcf   :  { %v759_v40 = vpop.f32.mrf.mxu1  ;;  %v799_v55 = vpop.f32.mrf.mxu2 }
  0xd0   :  { %v760_v43 = vadd.f32 %v759_v40, %v746_v39  ;;  %v800_v1 = vadd.f32 %v799_v55, %v786_v62 }
  0xd2   :  { %v774_v46 = vadd.f32 %v773_v41, %v760_v43 }
  0xd4   :  { %v876_v49 = vmax.f32 %v774_v46, 0.0  ;;  %v787_v58 = vpop.f32.mrf.mxu3 }
  0xd5   :  { %v788_v2 = vadd.f32 %v787_v58, %v146_v57 }
  0xd6   :  { %v878_v51 = vpack.c.bf16 %v876_v49, %v874_v47 }
  0xd7   :  { %v801_v61 = vpop.f32.mrf.mxu2 }
  0xd8   :  { %1020 = vmatmul.bf16.vlgmr.msrb.gmra.mxu1 %v878_v51  ;;  %v802_v7 = vadd.f32 %v801_v61, %v788_v2 }
  0xe4   :  { %v813_v59 = vpop.f32.mrf.mxu0 }
  0xe5   :  { %v814_v8 = vadd.f32 %v813_v59, %v800_v1 }
  0xe7   :  { %v827_v0 = vpop.f32.mrf.mxu1 }
  0xe8   :  { %v828_v54 = vadd.f32 %v827_v0, %v814_v8 }
  0xec   :  { %v841_v3 = vpop.f32.mrf.mxu3  ;;  %v815_v5 = vpop.f32.mrf.mxu0 }
  0xed   :  { %v816_v9 = vadd.f32 %v815_v5, %v802_v7  ;;  %v842_v37 = vadd.f32 %v841_v3, %v828_v54 }
  0xef   :  { %v855_v6 = vpop.f32.mrf.mxu2  ;;  %v829_v10 = vpop.f32.mrf.mxu1 }
  0xf0   :  { %v830_v44 = vadd.f32 %v829_v10, %v816_v9  ;;  %v856_v13 = vadd.f32 %v855_v6, %v842_v37 }
  0xf4   :  { %v843_v63 = vpop.f32.mrf.mxu3  ;;  %v869_v48 = vpop.f32.mrf.mxu0 }
  0xf5   :  { %v844_v11 = vadd.f32 %v843_v63, %v830_v44  ;;  %v870_v14 = vadd.f32 %v869_v48, %v856_v13 }
  0xf7   :  { %v857_v12 = vpop.f32.mrf.mxu2  ;;  %v875_v4 = vmax.f32 %v870_v14, 0.0 }
  0xf8   :  { %v858_v15 = vadd.f32 %v857_v12, %v844_v11 }
  0xfc   :  { %v871_v16 = vpop.f32.mrf.mxu0 }
  0xfd   :  { %v872_v17 = vadd.f32 %v871_v16, %v858_v15 }
  0xff   :  { %v877_v18 = vmax.f32 %v872_v17, 0.0 }
 0x101   :  { %v879_v60 = vpack.c.bf16 %v877_v18, %v875_v4 }
 0x103   :  { %1034 = vmatmul.bf16.vlgmr.msrb.gmra.mxu3 %v879_v60 }
 0x155   :  { %v1021_v19 = vpop.f32.mrf.mxu1 }
 0x156   :  { %v1022_v21 = vadd.f32 %v1677_v20, %v1021_v19 }
 0x15d   :  { %v1023_v24 = vpop.f32.mrf.mxu1 }
 0x15e   :  { %v1024_v25 = vadd.f32 %v1677_v20, %v1023_v24 }
 0x186   :  { %v1035_v22 = vpop.f32.mrf.mxu3 }
 0x187   :  { %v1036_v23 = vadd.f32 %v1035_v22, %v1022_v21 }
 0x189   :  { %1040 = vmax.xlane.f32.xlu0 %v1036_v23 }
 0x18e   :  { %v1037_v26 = vpop.f32.mrf.mxu3 }
 0x18f   :  { %v1038_v27 = vadd.f32 %v1037_v26, %v1024_v25 }
 0x191   :  { %1042 = vmax.xlane.f32.xlu0 %v1038_v27 }
 0x1fc   :  { %v1041_v28 = vpop.xlane.xlu0 %1040 }
 0x1fd   :  { %v1044_v29 = vsub.f32 %v1036_v23, %v1041_v28 }
 0x1ff   :  { %v1046_v30 = vmul.f32 1.442695, %v1044_v29 }
 0x201   :  { %1678 = vpow2.f32 %v1046_v30 }
 0x204   :  { %v1043_v31 = vpop.xlane.xlu0 %1042 }
 0x205   :  { %v1045_v32 = vsub.f32 %v1038_v27, %v1043_v31 }
 0x207   :  { %v1679_v33 = vpop.eup %1678  ;;  %v1048_v34 = vmul.f32 1.442695, %v1045_v32 }
 0x208   :  { %1050 = vadd.xlane.f32.xlu1 %v1679_v33 }
 0x209   :  { %1680 = vpow2.f32 %v1048_v34 }
 0x20f   :  { %v1681_v35 = vpop.eup %1680 }
 0x210   :  { %1052 = vadd.xlane.f32.xlu1 %v1681_v35 }
 0x27b   :  { %v1051_v36 = vpop.xlane.xlu1 %1050 }
 0x27c   :  { %1682 = vlog2.f32 %v1051_v36 }
 0x282   :  { %v1683_v38 = vpop.eup %1682 }
 0x283   :  { %v1055_v39 = vmul.f32 0.6931472, %v1683_v38  ;;  %v1053_v40 = vpop.xlane.xlu1 %1052 }
 0x284   :  { %1684 = vlog2.f32 %v1053_v40 }
 0x285   :  { %v1058_v41 = vsub.f32 %v1044_v29, %v1055_v39 }
 0x287   :  { %1060 = vst [vmem:[%s1885_s5] sm:$0xff] %v1058_v41 }
 0x28a   :  { %v1685_v42 = vpop.eup %1684 }
 0x28b   :  { %v1057_v43 = vmul.f32 0.6931472, %v1685_v42 }
 0x28d   :  { %v1059_v45 = vsub.f32 %v1045_v32, %v1057_v43 }
 0x28f   :  { %1061 = vst [vmem:[%s1885_s5 + $0x8] sm:$0xff] %v1059_v45 }
 0x290   :  { %1066 = vsyncpa [#allocation3], 1 }

</bundles_post_ra>
